<compile_context>
chip_gen: v5e
topology: v5e:2x2
jax: 0.10.0
libtpu: 0.0.40
codegen_flags: <defaults>
</compile_context>

<pallas_src>
import functools

import jax
import jax.numpy as jnp
from jax.experimental import pallas as pl
from jax.experimental.pallas import tpu as pltpu


def _round_up(x, m):
    return (x + m - 1) // m * m


def _label_smoothing_kernel(pred_ref, xt_ref, out_ref, *, classes, smoothing,
                            n_valid, tile_n, c_chunk):
    """Per-tile partial sum of the label-smoothed cross entropy.

    pred_ref: (tile_n, C) logits in their input dtype.
    xt_ref:   (1, tile_n) f32 logit at the target index (gathered in the
              wrapper, zero-padded past n_valid).
    out_ref:  (8, 128) f32, filled with this tile's partial sum (lane-dense).
    """
    conf = 1.0 - smoothing
    s = smoothing / (classes - 1)
    c = pred_ref.shape[-1]

    if c_chunk >= c:
        # Small vocab: single pass, one (tile_n, C) f32 temporary.
        x = pred_ref[...].astype(jnp.float32)
        m = jnp.max(x, axis=-1, keepdims=True)
        sum_x = jnp.sum(x, axis=-1, keepdims=True)
        sum_e = jnp.sum(jnp.exp(x - m), axis=-1, keepdims=True)
    else:
        # Large vocab: chunk the class dim so live f32 temporaries stay
        # bounded to one chunk; re-reading the resident block from VMEM is
        # nearly free (3 vld/cycle).
        starts = list(range(0, c, c_chunk))
        m = jnp.full((tile_n, 1), -jnp.inf, jnp.float32)
        sum_x = jnp.zeros((tile_n, 1), jnp.float32)
        for c0 in starts:                      # pass 1: running max & sum(x)
            cw = min(c_chunk, c - c0)
            xc = pred_ref[:, c0:c0 + cw].astype(jnp.float32)
            m = jnp.maximum(m, jnp.max(xc, axis=-1, keepdims=True))
            sum_x = sum_x + jnp.sum(xc, axis=-1, keepdims=True)
        sum_e = jnp.zeros((tile_n, 1), jnp.float32)
        for c0 in starts:                      # pass 2: sum(exp(x - m))
            cw = min(c_chunk, c - c0)
            xc = pred_ref[:, c0:c0 + cw].astype(jnp.float32)
            sum_e = sum_e + jnp.sum(jnp.exp(xc - m), axis=-1, keepdims=True)

    lse = m + jnp.log(sum_e)                                   # (tile_n, 1)

    # Folded smoothed CE: loss_r = lse_r - s*sum_x_r - (conf - s)*x_t_r.
    # Rows of the last block overhanging the real batch hold undefined data;
    # the select discards their contribution (x_t is already zero-padded).
    row = jax.lax.broadcasted_iota(jnp.int32, (tile_n, 1), 0)
    valid = (pl.program_id(0) * tile_n + row) < n_valid
    per_row = jnp.where(valid, lse - s * sum_x, 0.0)           # (tile_n, 1)

    partial = (jnp.sum(per_row, axis=0, keepdims=True)
               - (conf - s) * jnp.sum(xt_ref[...], axis=1, keepdims=True))
    out_ref[...] = jnp.broadcast_to(partial, out_ref.shape)    # (8, 128)


def label_smoothing_loss(pred, target, *, classes, smoothing=0.1,
                         c_chunk=2048):
    """pred: (N, C) float logits, target: (N,) int labels. Returns scalar mean loss."""
    n, c = pred.shape
    assert c == classes

    # Hoisted target-logit gather (reads only N elements at the XLA level).
    x_t = jnp.take_along_axis(
        pred, target.reshape(n, 1).astype(jnp.int32), axis=-1)
    x_t = x_t.astype(jnp.float32).reshape(n)

    # --- generation-aware tile sizing --------------------------------------
    try:
        info = pltpu.get_tpu_info()
        vmem_cap = int(getattr(info, "vmem_capacity_bytes", 128 * 1024 * 1024))
    except Exception:
        vmem_cap = 128 * 1024 * 1024
    work_budget = int(vmem_cap * 0.65)     # ~42 MiB on v7x, ~83 MiB on v5e/v6e

    c_chunk = min(c, max(128, (c_chunk // 128) * 128))
    c_pad = _round_up(c, 128)
    live_f32 = 3                           # live f32 chunk-sized temporaries
    per_row_bytes = (2 * c_pad * pred.dtype.itemsize   # double-buffered pred
                     + live_f32 * c_chunk * 4          # f32 chunk temps
                     + 2 * 8 * 4)                      # lane-dense x_t block
    max_rows = max(8, (work_budget // per_row_bytes) // 8 * 8)

    tile_n = min(max_rows, _round_up(n, 8))
    if n >= 16:
        # Keep >= 2 grid steps so the "parallel" axis can feed both v7x cores.
        tile_n = min(tile_n, _round_up((n + 1) // 2, 8))
    num_tiles = pl.cdiv(n, tile_n)

    # pred is NOT padded (that would copy the whole array in HBM); only the
    # tiny x_t vector is zero-padded so it can be laid out lane-dense.
    n_pad = num_tiles * tile_n
    if n_pad != n:
        x_t = jnp.pad(x_t, (0, n_pad - n))
    x_t = x_t.reshape(num_tiles, 1, tile_n)

    kernel = functools.partial(
        _label_smoothing_kernel, classes=classes, smoothing=smoothing,
        n_valid=n, tile_n=tile_n, c_chunk=c_chunk)

    vmem_limit = int(min(vmem_cap * 7 // 8, work_budget + 16 * 1024 * 1024))

    partials = pl.pallas_call(
        kernel,
        out_shape=jax.ShapeDtypeStruct((num_tiles, 8, 128), jnp.float32),
        grid_spec=pltpu.PrefetchScalarGridSpec(
            num_scalar_prefetch=0,
            grid=(num_tiles,),
            in_specs=[
                pl.BlockSpec((tile_n, c), lambda i: (i, 0)),        # pred tile
                pl.BlockSpec((None, 1, tile_n), lambda i: (i, 0, 0)),  # x_t
            ],
            out_specs=pl.BlockSpec((None, 8, 128), lambda i: (i, 0, 0)),
        ),
        compiler_params=pltpu.CompilerParams(
            dimension_semantics=("parallel",),
            vmem_limit_bytes=vmem_limit,
        ),
    )(pred, x_t)

    # Each (8, 128) output block holds that tile's partial sum.
    return jnp.sum(partials[:, 0, 0]) / n


def _reference(pred, target, *, classes, smoothing=0.1):
    confidence = 1.0 - smoothing
    logp = jax.nn.log_softmax(pred.astype(jnp.float32), axis=-1)
    true_dist = jnp.full_like(logp, smoothing / (classes - 1))
    true_dist = true_dist.at[jnp.arange(pred.shape[0]), target].set(confidence)
    return jnp.mean(jnp.sum(-true_dist * logp, axis=-1))


if __name__ == "__main__":
    key = jax.random.PRNGKey(0)
    k1, k2, k3, k4 = jax.random.split(key, 4)

    # Small case matching the module spec (batch=8, classes=32).
    N, C = 8, 32
    pred = jax.random.normal(k1, (N, C), dtype=jnp.float32)
    target = jax.random.randint(k2, (N,), 0, C, dtype=jnp.int32)
    loss = jax.block_until_ready(
        label_smoothing_loss(pred, target, classes=C, smoothing=0.1))
    ref = _reference(pred, target, classes=C, smoothing=0.1)
    assert jnp.allclose(loss, ref, atol=1e-5, rtol=1e-5), (loss, ref)

    # Exercise the overhang-mask (N not a multiple of tile) and the chunked
    # class-dim path (ragged last chunk).
    N2, C2 = 37, 320
    pred2 = jax.random.normal(k3, (N2, C2), dtype=jnp.float32)
    target2 = jax.random.randint(k4, (N2,), 0, C2, dtype=jnp.int32)
    loss2 = jax.block_until_ready(
        label_smoothing_loss(pred2, target2, classes=C2, smoothing=0.1,
                             c_chunk=128))
    ref2 = _reference(pred2, target2, classes=C2, smoothing=0.1)
    assert jnp.allclose(loss2, ref2, atol=1e-5, rtol=1e-5), (loss2, ref2)

    print("KERNEL_OK")
</pallas_src>

<mosaic_0001>
module attributes {stable_mosaic.version = 11 : i64} {
  func.func @_label_smoothing_kernel(%arg0: i32, %arg1: memref<8x32xf32, #tpu.memory_space<vmem>>, %arg2: memref<1x1x8xf32, #tpu.memory_space<vmem>>, %arg3: memref<1x8x128xf32, #tpu.memory_space<vmem>>) attributes {dimension_semantics = [#tpu.dimension_semantics<parallel>], iteration_bounds = array<i64: 1>, scalar_prefetch = 0 : i64, scratch_operands = 0 : i64, tpu.core_type = #tpu.core_type<tc>, window_params = [{transform_indices = @transform_0, window_bounds = array<i64: 8, 32>}, {transform_indices = @transform_1, window_bounds = array<i64: 1, 1, 8>}, {transform_indices = @transform_2, window_bounds = array<i64: 1, 8, 128>}]} {
    %c0 = arith.constant 0 : index
    %c0_0 = arith.constant 0 : index
    %0 = vector.load %arg1[%c0, %c0_0] : memref<8x32xf32, #tpu.memory_space<vmem>>, vector<8x32xf32>
    %cst = arith.constant dense<0xFF800000> : vector<8xf32>
    %1 = vector.multi_reduction <maximumf>, %0, %cst [1] : vector<8x32xf32> to vector<8xf32>
    %2 = vector.shape_cast %1 : vector<8xf32> to vector<8x1xf32>
    %cst_1 = arith.constant dense<0.000000e+00> : vector<8xf32>
    %3 = vector.multi_reduction <add>, %0, %cst_1 [1] : vector<8x32xf32> to vector<8xf32>
    %4 = vector.shape_cast %3 : vector<8xf32> to vector<8x1xf32>
    %5 = vector.broadcast %2 : vector<8x1xf32> to vector<8x32xf32>
    %6 = arith.subf %0, %5 : vector<8x32xf32>
    %7 = math.exp %6 : vector<8x32xf32>
    %cst_2 = arith.constant dense<0.000000e+00> : vector<8xf32>
    %8 = vector.multi_reduction <add>, %7, %cst_2 [1] : vector<8x32xf32> to vector<8xf32>
    %9 = vector.shape_cast %8 : vector<8xf32> to vector<8x1xf32>
    %10 = math.log %9 : vector<8x1xf32>
    %11 = arith.addf %2, %10 : vector<8x1xf32>
    %12 = tpu.iota {dimensions = array<i32: 0>} : vector<8x1xi32>
    %c8_i32 = arith.constant 8 : i32
    %13 = arith.muli %arg0, %c8_i32 : i32
    %14 = vector.broadcast %13 : i32 to vector<8x1xi32>
    %15 = arith.addi %14, %12 : vector<8x1xi32>
    %c8_i32_3 = arith.constant 8 : i32
    %16 = vector.broadcast %c8_i32_3 : i32 to vector<8x1xi32>
    %17 = arith.cmpi slt, %15, %16 : vector<8x1xi32>
    %cst_4 = arith.constant 0.0032258064 : f32
    %18 = vector.broadcast %cst_4 : f32 to vector<8x1xf32>
    %19 = arith.mulf %18, %4 : vector<8x1xf32>
    %20 = arith.subf %11, %19 : vector<8x1xf32>
    %cst_5 = arith.constant 0.000000e+00 : f32
    %21 = vector.broadcast %cst_5 : f32 to vector<8x1xf32>
    %22 = arith.select %17, %20, %21 : vector<8x1xi1>, vector<8x1xf32>
    %cst_6 = arith.constant dense<0.000000e+00> : vector<1xf32>
    %23 = vector.multi_reduction <add>, %22, %cst_6 [0] : vector<8x1xf32> to vector<1xf32>
    %24 = vector.shape_cast %23 : vector<1xf32> to vector<1x1xf32>
    %c0_7 = arith.constant 0 : index
    %c0_8 = arith.constant 0 : index
    %c0_9 = arith.constant 0 : index
    %25 = vector.load %arg2[%c0_7, %c0_8, %c0_9] : memref<1x1x8xf32, #tpu.memory_space<vmem>>, vector<1x1x8xf32>
    %26 = vector.shape_cast %25 : vector<1x1x8xf32> to vector<1x8xf32>
    %cst_10 = arith.constant dense<0.000000e+00> : vector<1xf32>
    %27 = vector.multi_reduction <add>, %26, %cst_10 [1] : vector<1x8xf32> to vector<1xf32>
    %28 = vector.shape_cast %27 : vector<1xf32> to vector<1x1xf32>
    %cst_11 = arith.constant 0.896774172 : f32
    %29 = vector.broadcast %cst_11 : f32 to vector<1x1xf32>
    %30 = arith.mulf %29, %28 : vector<1x1xf32>
    %31 = arith.subf %24, %30 : vector<1x1xf32>
    %32 = vector.shape_cast %31 : vector<1x1xf32> to vector<1x1xf32>
    %33 = vector.broadcast %32 : vector<1x1xf32> to vector<8x128xf32>
    %c0_12 = arith.constant 0 : index
    %c0_13 = arith.constant 0 : index
    %c0_14 = arith.constant 0 : index
    %34 = vector.load %arg3[%c0_12, %c0_13, %c0_14] : memref<1x8x128xf32, #tpu.memory_space<vmem>>, vector<1x8x128xf32>
    %35 = vector.shape_cast %34 : vector<1x8x128xf32> to vector<8x128xf32>
    %36 = vector.shape_cast %33 : vector<8x128xf32> to vector<1x8x128xf32>
    tpu.vector_store %arg3[%c0_12, %c0_13, %c0_14], %36 {strides = array<i32>} : memref<1x8x128xf32, #tpu.memory_space<vmem>>, vector<1x8x128xf32>,
    return
  }
  func.func @transform_0(%arg0: i32) -> (i32, i32) {
    %c0_i32 = arith.constant 0 : i32
    %c0_i32_0 = arith.constant 0 : i32
    return %arg0, %c0_i32 : i32, i32
  }
  func.func @transform_1(%arg0: i32) -> (i32, i32, i32) {
    %c0_i32 = arith.constant 0 : i32
    %c0_i32_0 = arith.constant 0 : i32
    %c0_i32_1 = arith.constant 0 : i32
    return %arg0, %c0_i32, %c0_i32_0 : i32, i32, i32
  }
  func.func @transform_2(%arg0: i32) -> (i32, i32, i32) {
    %c0_i32 = arith.constant 0 : i32
    %c0_i32_0 = arith.constant 0 : i32
    %c0_i32_1 = arith.constant 0 : i32
    return %arg0, %c0_i32, %c0_i32_0 : i32, i32, i32
  }
}

</mosaic_0001>

<bundles_post_ra>
// kernel: tpu_custom_call.1
= control target key start
LH: loop header
LB: loop body
LE: loop exit
PB: predicated region body
PF: predicated region fallthrough
CT: control target
= control target key end

     0   :  { %7 = vsyncpa [#allocation3], 0  ;;  %s211_s0 = inlined_call_operand.hbm [shape: f32[8,32], index: 0, kind: input, shape index: {}]   ;;  %s212_s1 = inlined_call_operand.hbm [shape: f32[1,1,8], index: 1, kind: input, shape index: {}]   ;;  %s213_s2 = inlined_call_operand.hbm [shape: f32[1,8,128], index: 2, kind: output, shape index: {}]  }
   0x1   :  { %8 = vsyncpa [#allocation6], 0 }
   0x2   :  { %9 = vsyncpa [#allocation4], 0  ;;  %s15_s11 = sshll.u32 %s211_s0, 4  ;;  %s184_s12 = smov [#allocation2]   ;;  %s16_s11 = int_to_ptr.hbm [resolvable:$true] %s15_s11 }
   0x3   :  { %s17_s13 = sshll.u32 %s184_s12, 4  ;;  %s26_s16 = sshll.u32 %s212_s1, 4  ;;  %s18_s13 = int_to_ptr.vmem [resolvable:$true] %s17_s13  ;;  %s27_s16 = int_to_ptr.hbm [resolvable:$true] %s26_s16 }
   0x4   :  { %20 = dma.hbm_to_vmem [thread:$0]  %s16_s11, 128, %s18_s13, [#allocation3]  }
   0x5   :  { %s185_s17 = smov [#allocation5]  }
   0x6   :  { %s28_s18 = sshll.u32 %s185_s17, 4  ;;  %s29_s18 = int_to_ptr.vmem [resolvable:$true] %s28_s18 }
   0x7   :  { %31 = dma.hbm_to_vmem [thread:$0]  %s27_s16, 16, %s29_s18, [#allocation6]  }
   0x8   :  { %178 = dma.done.wait [#allocation3], 128  }
   0x9   :  { %179 = vsyncadd [#allocation3], 4294967168 }
   0xa   :  { %180 = dma.done.wait [#allocation6], 16  }
   0xb   :  { %181 = vsyncadd [#allocation6], 4294967280  ;;  %vm41_vm0 = vcmask 261120   ;;  %v40_v0 = vld [vmem:[#allocation2] sm:$0xff]  ;;  %v72_v3 = vld [vmem:[#allocation5] sm:$0x1] }
   0xc   :  { %v42_v1 = vsel %vm41_vm0, %v40_v0, -inf  ;;  %v45_v2 = vsel %vm41_vm0, %v40_v0, 0.0  ;;  %vm73_vm1 = vcmask 57344   ;;  %s186_s0 = smov [#allocation7]   ;;  %s88_s21 = sshll.u32 %s213_s2, 4  ;;  %s89_s21 = int_to_ptr.hbm [resolvable:$true] %s88_s21 }
   0xd   :  { %43 = vmax.xlane.f32.xlu0 %v42_v1  ;;  %46 = vadd.xlane.f32.xlu1 %v45_v2  ;;  %v74_v4 = vsel %vm73_vm1, %v72_v3, 0.0  ;;  %s86_s1 = sshll.u32 %s186_s0, 4  ;;  %s87_s1 = int_to_ptr.vmem [resolvable:$true] %s86_s1 }
  0x15   :  { %75 = vadd.xlane.f32.xlu1 %v74_v4 }
  0x80   :  { %v44_v5 = vpop.xlane.xlu0 %43  ;;  %v47_v11 = vpop.xlane.xlu1 %46 }
  0x81   :  { %v48_v6 = vsub.f32 %v40_v0, %v44_v5  ;;  %v63_v14 = vmul.f32 0.0032258064, %v47_v11 }
  0x83   :  { %v49_v7 = vmul.f32 1.442695, %v48_v6 }
  0x85   :  { %102 = vpow2.f32 %v49_v7 }
  0x88   :  { %v76_v20 = vpop.xlane.xlu1 %75 }
  0x89   :  { %v77_v23 = vmul.f32 0.8967742, %v76_v20 }
  0x8b   :  { %v103_v8 = vpop.eup %102 }
  0x8c   :  { %v51_v9 = vsel %vm41_vm0, %v103_v8, 0.0 }
  0x8d   :  { %52 = vadd.xlane.f32.xlu0 %v51_v9 }
 0x100   :  { %v53_v10 = vpop.xlane.xlu0 %52 }
 0x101   :  { %104 = vlog2.f32 %v53_v10 }
 0x107   :  { %v105_v12 = vpop.eup %104 }
 0x108   :  { %v55_v13 = vmul.f32 0.6931472, %v105_v12 }
 0x10a   :  { %v56_v15 = vadd.f32 %v55_v13, %v44_v5 }
 0x10c   :  { %v64_v16 = vsub.f32 %v56_v15, %v63_v14 }
 0x10e   :  { %v66_v17 = vrot.slane %v64_v16, 4 }
 0x110   :  { %v67_v18 = vadd.f32 %v66_v17, %v64_v16 }
 0x112   :  { %v68_v19 = vrot.slane %v67_v18, 2 }
 0x114   :  { %v69_v21 = vadd.f32 %v68_v19, %v67_v18 }
 0x116   :  { %v70_v22 = vrot.slane %v69_v21, 1 }
 0x118   :  { %v71_v24 = vadd.f32 %v70_v22, %v69_v21 }
 0x11a   :  { %v78_v25 = vsub.f32 %v71_v24, %v77_v23 }
 0x11c   :  { %v79_v26 = vperm.slane %v78_v25, 0 }
 0x11e   :  { %80 = vst [vmem:[#allocation7] sm:$0xff] %v79_v26 }
 0x11f   :  { %91 = dma.vmem_to_hbm [thread:$0]  %s87_s1, 128, %s89_s21, [#allocation4]  }
 0x120   :  { %182 = dma.done.wait [#allocation4], 128  }
 0x121   :  { %183 = vsyncadd [#allocation4], 4294967168 }
 0x122   :  { %96 = vsyncpa [#allocation3], 1 }
 0x123   :  { %97 = vsyncpa [#allocation6], 1 }
 0x124   :  { %98 = vsyncpa [#allocation4], 1 }

</bundles_post_ra>
